<compile_context>
chip_gen: v5e
topology: v5e:2x2
jax: 0.10.0
libtpu: 0.0.40
codegen_flags: <defaults>
</compile_context>

<pallas_src>
import functools

import jax
import jax.numpy as jnp
from jax.experimental import pallas as pl
from jax.experimental.pallas import tpu as pltpu

BN_EPS = 1e-5          # nn.BatchNorm1d default eps
NORM_EPS = 1e-12       # F.normalize default eps
_LANE = 128
_SUBLANE = 8


def _round_up(n, m):
    return ((n + m - 1) // m) * m


def _pick_tile(dim, unit, max_elems):
    """Largest t <= max_elems with t % unit == 0 and dim % t == 0.
    Falls back to the full dim (a full-extent block is always legal)."""
    if dim <= max_elems:
        return dim
    for mult in range(max_elems // unit, 0, -1):
        t = mult * unit
        if dim % t == 0:
            return t
    return dim


def projection_kernel(x_ref, w1_ref, b1_ref, gamma_ref, beta_ref, w2_ref,
                      o_ref, pool_acc, h_acc, *, inv_hw):
    ci = pl.program_id(0)          # channel-tile index (outer)
    ki = pl.program_id(1)          # HW-tile index (inner, reduction)
    nc = pl.num_programs(0)
    nk = pl.num_programs(1)

    @pl.when(jnp.logical_and(ci == 0, ki == 0))
    def _():
        h_acc[...] = jnp.zeros_like(h_acc)

    @pl.when(ki == 0)
    def _():
        pool_acc[...] = jnp.zeros_like(pool_acc)

    # Raw partial sum over this HW tile (lane-axis reduce on the XLU).
    # 1/HW is folded in once at finalize instead of per tile.
    pool_acc[...] += jnp.sum(x_ref[...], axis=-1)

    # End of the HW sweep for this channel slice: a single MXU matmul with
    # the matching (c_tile, hid_pad) slice of W1, accumulated into h_acc.
    @pl.when(ki == nk - 1)
    def _():
        h_acc[...] += jnp.dot(pool_acc[...], w1_ref[...],
                              preferred_element_type=jnp.float32)

    # Finalize: scale + bias, BatchNorm1d (training-mode, full-batch biased
    # variance), ReLU, second Linear, L2 normalize with max(||z||, eps) clamp.
    @pl.when(jnp.logical_and(ci == nc - 1, ki == nk - 1))
    def _():
        h = h_acc[...] * inv_hw + b1_ref[...]
        mean = jnp.mean(h, axis=0, keepdims=True)
        var = jnp.mean((h - mean) * (h - mean), axis=0, keepdims=True)
        h = (h - mean) * jax.lax.rsqrt(var + BN_EPS)
        h = h * gamma_ref[...] + beta_ref[...]
        h = jnp.maximum(h, 0.0)
        z = jnp.dot(h, w2_ref[...], preferred_element_type=jnp.float32)
        # z / max(||z||, eps)  ==  z * rsqrt(max(sum(z^2), eps^2))
        sq = jnp.sum(z * z, axis=1, keepdims=True)
        o_ref[...] = z * jax.lax.rsqrt(jnp.maximum(sq, NORM_EPS * NORM_EPS))


def projection_forward(x_nchw, w1, b1, gamma, beta, w2):
    """x_nchw: (B, C, H, W) float32. Returns (B, output_dim) float32."""
    B, C, H, W = x_nchw.shape
    HW = H * W
    hidden_dim = w1.shape[1]
    output_dim = w2.shape[1]

    # Free reshape (contiguous NCHW -> (B, C, HW)); no HBM transpose pass.
    x = x_nchw.reshape(B, C, HW)

    # Zero-pad hidden/output dims to lane width (128) for lane-dense MXU use
    # and unmasked output stores; padding is mathematically inert here.
    hid_pad = _round_up(hidden_dim, _LANE)
    out_pad = _round_up(output_dim, _LANE)
    w1_p = jnp.pad(w1, ((0, 0), (0, hid_pad - hidden_dim)))
    b1_p = jnp.pad(b1.reshape(1, -1), ((0, 0), (0, hid_pad - hidden_dim)))
    gamma_p = jnp.pad(gamma.reshape(1, -1), ((0, 0), (0, hid_pad - hidden_dim)))
    beta_p = jnp.pad(beta.reshape(1, -1), ((0, 0), (0, hid_pad - hidden_dim)))
    w2_p = jnp.pad(w2, ((0, hid_pad - hidden_dim), (0, out_pad - output_dim)))

    # Reduction tiling: HW on the lane axis (prefer multiples of 128), C on
    # the sublane axis, sized so each x block stays ~<= 4 MiB (double-buffered
    # by BlockSpec) — safe for v7x's 64 MiB VMEM and default scoped limits.
    hw_tile = _pick_tile(HW, _LANE, 1024)
    max_c = max(_SUBLANE, (4 * 1024 * 1024) // (4 * B * hw_tile))
    c_tile = _pick_tile(C, _SUBLANE, max_c)
    nc = C // c_tile
    nk = HW // hw_tile

    kernel = functools.partial(projection_kernel, inv_hw=1.0 / float(HW))

    bytes_accessed = 4 * (x.size + w1_p.size + w2_p.size
                          + 3 * hid_pad + B * out_pad)
    flops = B * C * HW + 2 * B * C * hid_pad + 2 * B * hid_pad * out_pad

    out = pl.pallas_call(
        kernel,
        out_shape=jax.ShapeDtypeStruct((B, out_pad), jnp.float32),
        grid_spec=pltpu.PrefetchScalarGridSpec(
            num_scalar_prefetch=0,
            grid=(nc, nk),
            in_specs=[
                pl.BlockSpec((B, c_tile, hw_tile), lambda ci, ki: (0, ci, ki)),
                pl.BlockSpec((c_tile, hid_pad), lambda ci, ki: (ci, 0)),
                pl.BlockSpec((1, hid_pad), lambda ci, ki: (0, 0)),
                pl.BlockSpec((1, hid_pad), lambda ci, ki: (0, 0)),
                pl.BlockSpec((1, hid_pad), lambda ci, ki: (0, 0)),
                pl.BlockSpec((hid_pad, out_pad), lambda ci, ki: (0, 0)),
            ],
            out_specs=pl.BlockSpec((B, out_pad), lambda ci, ki: (0, 0)),
            scratch_shapes=[
                pltpu.VMEM((B, c_tile), jnp.float32),    # pooled partial sums
                pltpu.VMEM((B, hid_pad), jnp.float32),   # pre-BN activations
            ],
        ),
        compiler_params=pltpu.CompilerParams(
            dimension_semantics=("arbitrary", "arbitrary"),
            vmem_limit_bytes=32 * 1024 * 1024,
        ),
        cost_estimate=pl.CostEstimate(
            flops=int(flops),
            transcendentals=int(2 * B * hid_pad + B),
            bytes_accessed=int(bytes_accessed),
        ),
    )(x, w1_p, b1_p, gamma_p, beta_p, w2_p)

    return out[:, :output_dim]


def reference_forward(x_nchw, w1, b1, gamma, beta, w2):
    """Pure-JAX reference matching PyTorch training-mode forward."""
    pooled = jnp.mean(x_nchw, axis=(2, 3))                 # (B, C)
    h = pooled @ w1 + b1
    mean = jnp.mean(h, axis=0, keepdims=True)
    var = jnp.mean((h - mean) ** 2, axis=0, keepdims=True)
    h = (h - mean) / jnp.sqrt(var + BN_EPS) * gamma + beta
    h = jnp.maximum(h, 0.0)
    z = h @ w2
    norm = jnp.sqrt(jnp.sum(z * z, axis=1, keepdims=True))
    return z / jnp.maximum(norm, NORM_EPS)


if __name__ == "__main__":
    # Small, module-consistent shapes (input_dim = C).
    B, C, H, W = 8, 32, 4, 4
    hidden_dim, output_dim = 32, 16

    key = jax.random.PRNGKey(0)
    kx, kw1, kb1, kg, kbt, kw2 = jax.random.split(key, 6)

    x = jax.random.normal(kx, (B, C, H, W), dtype=jnp.float32)

    # Deterministic synthetic parameters (Linear weights stored as (in, out)).
    w1 = jax.random.normal(kw1, (C, hidden_dim), dtype=jnp.float32) * 0.05
    b1 = jax.random.normal(kb1, (hidden_dim,), dtype=jnp.float32) * 0.05
    gamma = 1.0 + 0.1 * jax.random.normal(kg, (hidden_dim,), dtype=jnp.float32)
    beta = 0.1 * jax.random.normal(kbt, (hidden_dim,), dtype=jnp.float32)
    w2 = jax.random.normal(kw2, (hidden_dim, output_dim), dtype=jnp.float32) * 0.05

    out = projection_forward(x, w1, b1, gamma, beta, w2)
    out = jax.block_until_ready(out)

    ref = reference_forward(x, w1, b1, gamma, beta, w2)
    assert out.shape == (B, output_dim)
    assert jnp.allclose(out, ref, atol=1e-5, rtol=1e-5), "mismatch vs reference"

    print("KERNEL_OK")
</pallas_src>

<mosaic_0001>
module attributes {stable_mosaic.version = 11 : i64} {
  func.func @projection_kernel(%arg0: i32, %arg1: i32, %arg2: memref<8x32x16xf32, #tpu.memory_space<vmem>>, %arg3: memref<32x128xf32, #tpu.memory_space<vmem>>, %arg4: memref<1x128xf32, #tpu.memory_space<vmem>>, %arg5: memref<1x128xf32, #tpu.memory_space<vmem>>, %arg6: memref<1x128xf32, #tpu.memory_space<vmem>>, %arg7: memref<128x128xf32, #tpu.memory_space<vmem>>, %arg8: memref<8x128xf32, #tpu.memory_space<vmem>>, %arg9: memref<8x32xf32, #tpu.memory_space<vmem>>, %arg10: memref<8x128xf32, #tpu.memory_space<vmem>>) attributes {dimension_semantics = [#tpu.dimension_semantics<arbitrary>, #tpu.dimension_semantics<arbitrary>], iteration_bounds = array<i64: 1, 1>, scalar_prefetch = 0 : i64, scratch_operands = 2 : i64, tpu.core_type = #tpu.core_type<tc>, window_params = [{transform_indices = @transform_0, window_bounds = array<i64: 8, 32, 16>}, {transform_indices = @transform_1, window_bounds = array<i64: 32, 128>}, {pipeline_mode = #tpu.pipeline_mode<synchronous>, transform_indices = @transform_2, window_bounds = array<i64: 1, 128>}, {pipeline_mode = #tpu.pipeline_mode<synchronous>, transform_indices = @transform_3, window_bounds = array<i64: 1, 128>}, {pipeline_mode = #tpu.pipeline_mode<synchronous>, transform_indices = @transform_4, window_bounds = array<i64: 1, 128>}, {pipeline_mode = #tpu.pipeline_mode<synchronous>, transform_indices = @transform_5, window_bounds = array<i64: 128, 128>}, {pipeline_mode = #tpu.pipeline_mode<synchronous>, transform_indices = @transform_6, window_bounds = array<i64: 8, 128>}]} {
    %c0_i32 = arith.constant 0 : i32
    %0 = arith.cmpi eq, %arg0, %c0_i32 : i32
    %c0_i32_0 = arith.constant 0 : i32
    %1 = arith.cmpi eq, %arg1, %c0_i32_0 : i32
    %2 = arith.andi %0, %1 : i1
    %3 = arith.extui %2 : i1 to i32
    %c0_i32_1 = arith.constant 0 : i32
    %4 = arith.cmpi ne, %3, %c0_i32_1 : i32
    scf.if %4 {
      %cst_15 = arith.constant 0.000000e+00 : f32
      %21 = vector.broadcast %cst_15 : f32 to vector<8x128xf32>
      %c0_16 = arith.constant 0 : index
      %c0_17 = arith.constant 0 : index
      %22 = vector.load %arg10[%c0_16, %c0_17] : memref<8x128xf32, #tpu.memory_space<vmem>>, vector<8x128xf32>
      tpu.vector_store %arg10[%c0_16, %c0_17], %21 {strides = array<i32>} : memref<8x128xf32, #tpu.memory_space<vmem>>, vector<8x128xf32>,
    } else {
    }
    %c0_i32_2 = arith.constant 0 : i32
    %5 = arith.cmpi eq, %arg1, %c0_i32_2 : i32
    %6 = arith.extui %5 : i1 to i32
    %c0_i32_3 = arith.constant 0 : i32
    %7 = arith.cmpi ne, %6, %c0_i32_3 : i32
    scf.if %7 {
      %cst_15 = arith.constant 0.000000e+00 : f32
      %21 = vector.broadcast %cst_15 : f32 to vector<8x32xf32>
      %c0_16 = arith.constant 0 : index
      %c0_17 = arith.constant 0 : index
      %22 = vector.load %arg9[%c0_16, %c0_17] : memref<8x32xf32, #tpu.memory_space<vmem>>, vector<8x32xf32>
      tpu.vector_store %arg9[%c0_16, %c0_17], %21 {strides = array<i32>} : memref<8x32xf32, #tpu.memory_space<vmem>>, vector<8x32xf32>,
    } else {
    }
    %c0 = arith.constant 0 : index
    %c0_4 = arith.constant 0 : index
    %8 = vector.load %arg9[%c0, %c0_4] : memref<8x32xf32, #tpu.memory_space<vmem>>, vector<8x32xf32>
    %c0_5 = arith.constant 0 : index
    %c0_6 = arith.constant 0 : index
    %c0_7 = arith.constant 0 : index
    %9 = vector.load %arg2[%c0_5, %c0_6, %c0_7] : memref<8x32x16xf32, #tpu.memory_space<vmem>>, vector<8x32x16xf32>
    %cst = arith.constant dense<0.000000e+00> : vector<8x32xf32>
    %10 = vector.multi_reduction <add>, %9, %cst [2] : vector<8x32x16xf32> to vector<8x32xf32>
    %11 = arith.addf %8, %10 : vector<8x32xf32>
    %c0_8 = arith.constant 0 : index
    %c0_9 = arith.constant 0 : index
    %12 = vector.load %arg9[%c0_8, %c0_9] : memref<8x32xf32, #tpu.memory_space<vmem>>, vector<8x32xf32>
    tpu.vector_store %arg9[%c0_8, %c0_9], %11 {strides = array<i32>} : memref<8x32xf32, #tpu.memory_space<vmem>>, vector<8x32xf32>,
    %c0_i32_10 = arith.constant 0 : i32
    %13 = arith.cmpi eq, %arg1, %c0_i32_10 : i32
    %14 = arith.extui %13 : i1 to i32
    %c0_i32_11 = arith.constant 0 : i32
    %15 = arith.cmpi ne, %14, %c0_i32_11 : i32
    scf.if %15 {
      %c0_15 = arith.constant 0 : index
      %c0_16 = arith.constant 0 : index
      %21 = vector.load %arg10[%c0_15, %c0_16] : memref<8x128xf32, #tpu.memory_space<vmem>>, vector<8x128xf32>
      %c0_17 = arith.constant 0 : index
      %c0_18 = arith.constant 0 : index
      %22 = vector.load %arg9[%c0_17, %c0_18] : memref<8x32xf32, #tpu.memory_space<vmem>>, vector<8x32xf32>
      %c0_19 = arith.constant 0 : index
      %c0_20 = arith.constant 0 : index
      %23 = vector.load %arg3[%c0_19, %c0_20] : memref<32x128xf32, #tpu.memory_space<vmem>>, vector<32x128xf32>
      %cst_21 = arith.constant dense<0.000000e+00> : vector<8x128xf32>
      %24 = tpu.matmul %22, %23, %cst_21 {dimension_numbers = #tpu.dot_dimension_numbers<[1], [0], [0], [1], [0, 0, 1, 1], [], []>} : vector<8x32xf32>, vector<32x128xf32>, vector<8x128xf32> -> vector<8x128xf32>
      %25 = arith.addf %21, %24 : vector<8x128xf32>
      %c0_22 = arith.constant 0 : index
      %c0_23 = arith.constant 0 : index
      %26 = vector.load %arg10[%c0_22, %c0_23] : memref<8x128xf32, #tpu.memory_space<vmem>>, vector<8x128xf32>
      tpu.vector_store %arg10[%c0_22, %c0_23], %25 {strides = array<i32>} : memref<8x128xf32, #tpu.memory_space<vmem>>, vector<8x128xf32>,
    } else {
    }
    %c0_i32_12 = arith.constant 0 : i32
    %16 = arith.cmpi eq, %arg0, %c0_i32_12 : i32
    %c0_i32_13 = arith.constant 0 : i32
    %17 = arith.cmpi eq, %arg1, %c0_i32_13 : i32
    %18 = arith.andi %16, %17 : i1
    %19 = arith.extui %18 : i1 to i32
    %c0_i32_14 = arith.constant 0 : i32
    %20 = arith.cmpi ne, %19, %c0_i32_14 : i32
    scf.if %20 {
      %c0_15 = arith.constant 0 : index
      %c0_16 = arith.constant 0 : index
      %21 = vector.load %arg10[%c0_15, %c0_16] : memref<8x128xf32, #tpu.memory_space<vmem>>, vector<8x128xf32>
      %cst_17 = arith.constant 6.250000e-02 : f32
      %22 = vector.broadcast %cst_17 : f32 to vector<8x128xf32>
      %23 = arith.mulf %21, %22 : vector<8x128xf32>
      %c0_18 = arith.constant 0 : index
      %c0_19 = arith.constant 0 : index
      %24 = vector.load %arg4[%c0_18, %c0_19] : memref<1x128xf32, #tpu.memory_space<vmem>>, vector<1x128xf32>
      %25 = vector.broadcast %24 : vector<1x128xf32> to vector<8x128xf32>
      %26 = arith.addf %23, %25 : vector<8x128xf32>
      %cst_20 = arith.constant dense<0.000000e+00> : vector<128xf32>
      %27 = vector.multi_reduction <add>, %26, %cst_20 [0] : vector<8x128xf32> to vector<128xf32>
      %28 = vector.shape_cast %27 : vector<128xf32> to vector<1x128xf32>
      %cst_21 = arith.constant 8.000000e+00 : f32
      %29 = vector.broadcast %cst_21 : f32 to vector<1x128xf32>
      %30 = arith.divf %28, %29 : vector<1x128xf32>
      %31 = vector.broadcast %30 : vector<1x128xf32> to vector<8x128xf32>
      %32 = arith.subf %26, %31 : vector<8x128xf32>
      %33 = vector.broadcast %30 : vector<1x128xf32> to vector<8x128xf32>
      %34 = arith.subf %26, %33 : vector<8x128xf32>
      %35 = arith.mulf %32, %34 : vector<8x128xf32>
      %cst_22 = arith.constant dense<0.000000e+00> : vector<128xf32>
      %36 = vector.multi_reduction <add>, %35, %cst_22 [0] : vector<8x128xf32> to vector<128xf32>
      %37 = vector.shape_cast %36 : vector<128xf32> to vector<1x128xf32>
      %cst_23 = arith.constant 8.000000e+00 : f32
      %38 = vector.broadcast %cst_23 : f32 to vector<1x128xf32>
      %39 = arith.divf %37, %38 : vector<1x128xf32>
      %40 = vector.broadcast %30 : vector<1x128xf32> to vector<8x128xf32>
      %41 = arith.subf %26, %40 : vector<8x128xf32>
      %cst_24 = arith.constant 9.99999974E-6 : f32
      %42 = vector.broadcast %cst_24 : f32 to vector<1x128xf32>
      %43 = arith.addf %39, %42 : vector<1x128xf32>
      %44 = math.rsqrt %43 : vector<1x128xf32>
      %45 = vector.broadcast %44 : vector<1x128xf32> to vector<8x128xf32>
      %46 = arith.mulf %41, %45 : vector<8x128xf32>
      %c0_25 = arith.constant 0 : index
      %c0_26 = arith.constant 0 : index
      %47 = vector.load %arg5[%c0_25, %c0_26] : memref<1x128xf32, #tpu.memory_space<vmem>>, vector<1x128xf32>
      %48 = vector.broadcast %47 : vector<1x128xf32> to vector<8x128xf32>
      %49 = arith.mulf %46, %48 : vector<8x128xf32>
      %c0_27 = arith.constant 0 : index
      %c0_28 = arith.constant 0 : index
      %50 = vector.load %arg6[%c0_27, %c0_28] : memref<1x128xf32, #tpu.memory_space<vmem>>, vector<1x128xf32>
      %51 = vector.broadcast %50 : vector<1x128xf32> to vector<8x128xf32>
      %52 = arith.addf %49, %51 : vector<8x128xf32>
      %cst_29 = arith.constant 0.000000e+00 : f32
      %53 = vector.broadcast %cst_29 : f32 to vector<8x128xf32>
      %54 = arith.maximumf %52, %53 : vector<8x128xf32>
      %c0_30 = arith.constant 0 : index
      %c0_31 = arith.constant 0 : index
      %55 = vector.load %arg7[%c0_30, %c0_31] : memref<128x128xf32, #tpu.memory_space<vmem>>, vector<128x128xf32>
      %cst_32 = arith.constant dense<0.000000e+00> : vector<8x128xf32>
      %56 = tpu.matmul %54, %55, %cst_32 {dimension_numbers = #tpu.dot_dimension_numbers<[1], [0], [0], [1], [0, 0, 1, 1], [], []>} : vector<8x128xf32>, vector<128x128xf32>, vector<8x128xf32> -> vector<8x128xf32>
      %57 = arith.mulf %56, %56 : vector<8x128xf32>
      %cst_33 = arith.constant dense<0.000000e+00> : vector<8xf32>
      %58 = vector.multi_reduction <add>, %57, %cst_33 [1] : vector<8x128xf32> to vector<8xf32>
      %59 = vector.shape_cast %58 : vector<8xf32> to vector<8x1xf32>
      %cst_34 = arith.constant 1.000000e-24 : f32
      %60 = vector.broadcast %cst_34 : f32 to vector<8x1xf32>
      %61 = arith.maximumf %59, %60 : vector<8x1xf32>
      %62 = math.rsqrt %61 : vector<8x1xf32>
      %63 = vector.broadcast %62 : vector<8x1xf32> to vector<8x128xf32>
      %64 = arith.mulf %56, %63 : vector<8x128xf32>
      %c0_35 = arith.constant 0 : index
      %c0_36 = arith.constant 0 : index
      %65 = vector.load %arg8[%c0_35, %c0_36] : memref<8x128xf32, #tpu.memory_space<vmem>>, vector<8x128xf32>
      tpu.vector_store %arg8[%c0_35, %c0_36], %64 {strides = array<i32>} : memref<8x128xf32, #tpu.memory_space<vmem>>, vector<8x128xf32>,
    } else {
    }
    return
  }
  func.func @transform_0(%arg0: i32, %arg1: i32) -> (i32, i32, i32) {
    %c0_i32 = arith.constant 0 : i32
    %c0_i32_0 = arith.constant 0 : i32
    return %c0_i32, %arg0, %arg1 : i32, i32, i32
  }
  func.func @transform_1(%arg0: i32, %arg1: i32) -> (i32, i32) {
    %c0_i32 = arith.constant 0 : i32
    %c0_i32_0 = arith.constant 0 : i32
    return %arg0, %c0_i32 : i32, i32
  }
  func.func @transform_2(%arg0: i32, %arg1: i32) -> (i32, i32) {
    %c0_i32 = arith.constant 0 : i32
    %c0_i32_0 = arith.constant 0 : i32
    %c0_i32_1 = arith.constant 0 : i32
    return %c0_i32, %c0_i32_0 : i32, i32
  }
  func.func @transform_3(%arg0: i32, %arg1: i32) -> (i32, i32) {
    %c0_i32 = arith.constant 0 : i32
    %c0_i32_0 = arith.constant 0 : i32
    %c0_i32_1 = arith.constant 0 : i32
    return %c0_i32, %c0_i32_0 : i32, i32
  }
  func.func @transform_4(%arg0: i32, %arg1: i32) -> (i32, i32) {
    %c0_i32 = arith.constant 0 : i32
    %c0_i32_0 = arith.constant 0 : i32
    %c0_i32_1 = arith.constant 0 : i32
    return %c0_i32, %c0_i32_0 : i32, i32
  }
  func.func @transform_5(%arg0: i32, %arg1: i32) -> (i32, i32) {
    %c0_i32 = arith.constant 0 : i32
    %c0_i32_0 = arith.constant 0 : i32
    %c0_i32_1 = arith.constant 0 : i32
    return %c0_i32, %c0_i32_0 : i32, i32
  }
  func.func @transform_6(%arg0: i32, %arg1: i32) -> (i32, i32) {
    %c0_i32 = arith.constant 0 : i32
    %c0_i32_0 = arith.constant 0 : i32
    %c0_i32_1 = arith.constant 0 : i32
    return %c0_i32, %c0_i32_0 : i32, i32
  }
}

</mosaic_0001>

<bundles_post_ra>
// kernel: tpu_custom_call.1
= control target key start
LH: loop header
LB: loop body
LE: loop exit
PB: predicated region body
PF: predicated region fallthrough
CT: control target
= control target key end

     0   :  { %vm69_vm0 = vcmask 130048   ;;  %s789_s0 = inlined_call_operand.vmem [shape: f32[8,32,16], index: 0, kind: input, shape index: {}]   ;;  %s790_s1 = inlined_call_operand.vmem [shape: f32[32,128], index: 1, kind: input, shape index: {}]   ;;  %s791_s2 = inlined_call_operand.vmem [shape: f32[1,128], index: 2, kind: input, shape index: {}]   ;;  %s792_s3 = inlined_call_operand.vmem [shape: f32[1,128], index: 3, kind: input, shape index: {}]   ;;  %s793_s4 = inlined_call_operand.vmem [shape: f32[1,128], index: 4, kind: input, shape index: {}]   ;;  %s794_s5 = inlined_call_operand.vmem [shape: f32[128,128], index: 5, kind: input, shape index: {}]   ;;  %s795_s6 = inlined_call_operand.hbm [shape: f32[8,128], index: 6, kind: output, shape index: {}]  }
   0x1   :  { %v41_v0 = vld [vmem:[%s789_s0 + $0x20] sm:$0xff]  ;;  %v39_v1 = vld [vmem:[%s789_s0 + $0x10] sm:$0xff]  ;;  %v42_v6 = vld [vmem:[%s789_s0 + $0x28] sm:$0xff] }
   0x2   :  { %v37_v2 = vld [vmem:[%s789_s0] sm:$0xff]  ;;  %v82_v3 = vsel %vm69_vm0, %v41_v0, 0.0  ;;  %v76_v4 = vsel %vm69_vm0, %v39_v1, 0.0  ;;  %v43_v7 = vld [vmem:[%s789_s0 + $0x30] sm:$0xff]  ;;  %v38_v8 = vld [vmem:[%s789_s0 + $0x8] sm:$0xff]  ;;  %v85_v9 = vsel %vm69_vm0, %v42_v6, 0.0 }
   0x3   :  { %v70_v5 = vsel %vm69_vm0, %v37_v2, 0.0  ;;  %83 = vadd.xlane.f32.xlu1 %v82_v3  ;;  %77 = vadd.xlane.f32.xlu2 %v76_v4  ;;  %v88_v10 = vsel %vm69_vm0, %v43_v7, 0.0 }
   0x4   :  { %71 = vadd.xlane.f32.xlu0 %v70_v5 }
   0x5   :  { %11 = vsyncpa [#allocation5], 0  ;;  %v73_v11 = vsel %vm69_vm0, %v38_v8, 0.0  ;;  %v46_v12 = vld [vmem:[%s789_s0 + $0x48] sm:$0xff]  ;;  %v40_v13 = vld [vmem:[%s789_s0 + $0x18] sm:$0xff]  ;;  %v198_v0 = vlaneseq  ;;  %vm203_vm1 = vcmask 130112  }
   0x6   :  { %v45_v14 = vld [vmem:[%s789_s0 + $0x40] sm:$0xff]  ;;  %v97_v15 = vsel %vm69_vm0, %v46_v12, 0.0  ;;  %v79_v16 = vsel %vm69_vm0, %v40_v13, 0.0  ;;  %v47_v18 = vld [vmem:[%s789_s0 + $0x50] sm:$0xff]  ;;  %v44_v20 = vld [vmem:[%s789_s0 + $0x38] sm:$0xff]  ;;  %vm207_vm2 = vcmask 195712  }
   0x7   :  { %v94_v17 = vsel %vm69_vm0, %v45_v14, 0.0  ;;  %v49_v19 = vld [vmem:[%s789_s0 + $0x60] sm:$0xff]  ;;  %v100_v21 = vsel %vm69_vm0, %v47_v18, 0.0  ;;  %v91_v23 = vsel %vm69_vm0, %v44_v20, 0.0  ;;  %v48_v24 = vld [vmem:[%s789_s0 + $0x58] sm:$0xff]  ;;  %v51_v25 = vld [vmem:[%s789_s0 + $0x70] sm:$0xff] }
   0x8   :  { %v106_v22 = vsel %vm69_vm0, %v49_v19, 0.0  ;;  %v50_v26 = vld [vmem:[%s789_s0 + $0x68] sm:$0xff]  ;;  %v103_v27 = vsel %vm69_vm0, %v48_v24, 0.0  ;;  %v112_v28 = vsel %vm69_vm0, %v51_v25, 0.0  ;;  %v52_v31 = vld [vmem:[%s789_s0 + $0x78] sm:$0xff]  ;;  %v53_v32 = vld [vmem:[%s789_s0 + $0x80] sm:$0xff] }
   0x9   :  { %v109_v29 = vsel %vm69_vm0, %v50_v26, 0.0  ;;  %v54_v30 = vld [vmem:[%s789_s0 + $0x88] sm:$0xff]  ;;  %v115_v34 = vsel %vm69_vm0, %v52_v31, 0.0  ;;  %v118_v35 = vsel %vm69_vm0, %v53_v32, 0.0  ;;  %v57_v36 = vld [vmem:[%s789_s0 + $0xa0] sm:$0xff]  ;;  %v55_v38 = vld [vmem:[%s789_s0 + $0x90] sm:$0xff] }
   0xa   :  { %v121_v33 = vsel %vm69_vm0, %v54_v30, 0.0  ;;  %v58_v37 = vld [vmem:[%s789_s0 + $0xa8] sm:$0xff]  ;;  %v130_v39 = vsel %vm69_vm0, %v57_v36, 0.0  ;;  %v124_v41 = vsel %vm69_vm0, %v55_v38, 0.0  ;;  %v59_v42 = vld [vmem:[%s789_s0 + $0xb0] sm:$0xff]  ;;  %v61_v43 = vld [vmem:[%s789_s0 + $0xc0] sm:$0xff] }
   0xb   :  { %86 = vadd.xlane.f32.xlu1 %v85_v9  ;;  %89 = vadd.xlane.f32.xlu2 %v88_v10  ;;  %v133_v40 = vsel %vm69_vm0, %v58_v37, 0.0  ;;  %v56_v44 = vld [vmem:[%s789_s0 + $0x98] sm:$0xff]  ;;  %v136_v45 = vsel %vm69_vm0, %v59_v42, 0.0  ;;  %v142_v46 = vsel %vm69_vm0, %v61_v43, 0.0  ;;  %v63_v49 = vld [vmem:[%s789_s0 + $0xd0] sm:$0xff]  ;;  %v62_v50 = vld [vmem:[%s789_s0 + $0xc8] sm:$0xff] }
   0xc   :  { %74 = vadd.xlane.f32.xlu0 %v73_v11  ;;  %v127_v47 = vsel %vm69_vm0, %v56_v44, 0.0  ;;  %v60_v48 = vld [vmem:[%s789_s0 + $0xb8] sm:$0xff]  ;;  %v148_v52 = vsel %vm69_vm0, %v63_v49, 0.0  ;;  %v145_v53 = vsel %vm69_vm0, %v62_v50, 0.0  ;;  %v66_v54 = vld [vmem:[%s789_s0 + $0xe8] sm:$0xff]  ;;  %v65_v56 = vld [vmem:[%s789_s0 + $0xe0] sm:$0xff] }
   0xd   :  { %v139_v51 = vsel %vm69_vm0, %v60_v48, 0.0  ;;  %v64_v55 = vld [vmem:[%s789_s0 + $0xd8] sm:$0xff]  ;;  %v157_v57 = vsel %vm69_vm0, %v66_v54, 0.0  ;;  %v154_v59 = vsel %vm69_vm0, %v65_v56, 0.0  ;;  %v67_v61 = vld [vmem:[%s789_s0 + $0xf0] sm:$0xff]  ;;  %v642_v4 = vand.u32 127, %v198_v0 }
   0xe   :  { %v151_v58 = vsel %vm69_vm0, %v64_v55, 0.0  ;;  %v68_v60 = vld [vmem:[%s789_s0 + $0xf8] sm:$0xff]  ;;  %v160_v63 = vsel %vm69_vm0, %v67_v61, 0.0  ;;  %vm211_vm3 = vcmask 261312   ;;  %vm262_vm4 = vcmask 1041409   ;;  %v287_v43 = vld [vmem:[%s790_s1 + $0x10] sm:$0xff] }
   0xf   :  { %v163_v62 = vsel %vm69_vm0, %v68_v60, 0.0  ;;  %v645_v5 = vadd.s32 4294967280, %v642_v4  ;;  %v648_v6 = vadd.s32 4294967288, %v642_v4  ;;  %vm34_vm5 = vcmask 261120   ;;  %v288_v42 = vld [vmem:[%s790_s1 + $0x18] sm:$0xff]  ;;  %v285_v48 = vld [vmem:[%s790_s1] sm:$0xff] }
  0x10   :  { %v476_v38 = vmov 0.0   ;;  %304 = vmatpush.msra.mxu0 %v288_v42  ;;  %vm264_vm6 = vcmask 1042434   ;;  %vm266_vm7 = vcmask 1043459   ;;  %vm268_vm8 = vcmask 1044484   ;;  %s428_s30 = sshll.u32 %s795_s6, 4  ;;  %s429_s30 = int_to_ptr.hbm [resolvable:$true] %s428_s30 }
  0x11   :  { %35 = vst.msk [vmem:[#allocation2] sm:$0xff] %vm34_vm5, %v476_v38  ;;  %vm270_vm9 = vcmask 1045509   ;;  %vm272_vm10 = vcmask 1046534   ;;  %vm274_vm11 = vcmask 1047559  }
  0x12   :  { %305 = vmatpush.msra.mxu0 %v287_v43 }
  0x13   :  { %98 = vadd.xlane.f32.xlu1 %v97_v15  ;;  %80 = vadd.xlane.f32.xlu2 %v79_v16 }
  0x14   :  { %95 = vadd.xlane.f32.xlu0 %v94_v17 }
  0x1b   :  { %101 = vadd.xlane.f32.xlu1 %v100_v21  ;;  %107 = vadd.xlane.f32.xlu2 %v106_v22  ;;  %v659_v21 = vadd.s32 4294967272, %v642_v4 }
  0x1c   :  { %92 = vadd.xlane.f32.xlu0 %v91_v23 }
  0x23   :  { %104 = vadd.xlane.f32.xlu1 %v103_v27  ;;  %113 = vadd.xlane.f32.xlu2 %v112_v28 }
  0x24   :  { %110 = vadd.xlane.f32.xlu0 %v109_v29 }
  0x2b   :  { %122 = vadd.xlane.f32.xlu1 %v121_v33  ;;  %116 = vadd.xlane.f32.xlu2 %v115_v34 }
  0x2c   :  { %119 = vadd.xlane.f32.xlu0 %v118_v35 }
  0x33   :  { %131 = vadd.xlane.f32.xlu1 %v130_v39  ;;  %134 = vadd.xlane.f32.xlu2 %v133_v40 }
  0x34   :  { %125 = vadd.xlane.f32.xlu0 %v124_v41 }
  0x3b   :  { %137 = vadd.xlane.f32.xlu1 %v136_v45  ;;  %143 = vadd.xlane.f32.xlu2 %v142_v46  ;;  %v286_v46 = vld [vmem:[%s790_s1 + $0x8] sm:$0xff] }
  0x3c   :  { %128 = vadd.xlane.f32.xlu0 %v127_v47  ;;  %306 = vmatpush.msra.mxu0 %v286_v46 }
  0x3e   :  { %307 = vmatpush.msra.mxu0 %v285_v48 }
  0x43   :  { %140 = vadd.xlane.f32.xlu1 %v139_v51  ;;  %149 = vadd.xlane.f32.xlu2 %v148_v52 }
  0x44   :  { %146 = vadd.xlane.f32.xlu0 %v145_v53 }
  0x4b   :  { %158 = vadd.xlane.f32.xlu1 %v157_v57  ;;  %152 = vadd.xlane.f32.xlu2 %v151_v58 }
  0x4c   :  { %155 = vadd.xlane.f32.xlu0 %v154_v59 }
  0x53   :  { %164 = vadd.xlane.f32.xlu1 %v163_v62 }
  0x54   :  { %161 = vadd.xlane.f32.xlu0 %v160_v63 }
  0x76   :  { %v84_v1 = vpop.xlane.xlu1 %83  ;;  %v78_v2 = vpop.xlane.xlu2 %77 }
  0x77   :  { %v72_v3 = vpop.xlane.xlu0 %71  ;;  %v213_v9 = vperm.slane %v84_v1, %v642_v4  ;;  %v206_v10 = vperm.slane %v78_v2, %v645_v5 }
  0x78   :  { %v200_v13 = vperm.slane %v72_v3, %v642_v4 }
  0x7e   :  { %v87_v7 = vpop.xlane.xlu1 %86  ;;  %v90_v8 = vpop.xlane.xlu2 %89 }
  0x7f   :  { %v214_v11 = vperm.slane %v87_v7, %v648_v6  ;;  %v75_v12 = vpop.xlane.xlu0 %74  ;;  %v216_v22 = vperm.slane %v90_v8, %v645_v5 }
  0x80   :  { %v202_v14 = vperm.slane %v75_v12, %v648_v6 }
  0x81   :  { %v215_v15 = vsel %vm203_vm1, %v214_v11, %v213_v9 }
  0x82   :  { %v204_v16 = vsel %vm203_vm1, %v202_v14, %v200_v13  ;;  %v217_v28 = vsel %vm207_vm2, %v216_v22, %v215_v15 }
  0x83   :  { %v208_v17 = vsel %vm207_vm2, %v206_v10, %v204_v16 }
  0x86   :  { %v99_v18 = vpop.xlane.xlu1 %98  ;;  %v81_v19 = vpop.xlane.xlu2 %80 }
  0x87   :  { %v96_v20 = vpop.xlane.xlu0 %95  ;;  %v210_v23 = vperm.slane %v81_v19, %v659_v21  ;;  %v221_v54 = vperm.slane %v99_v18, %v648_v6 }
  0x88   :  { %v220_v55 = vperm.slane %v96_v20, %v642_v4 }
  0x89   :  { %v212_v29 = vsel %vm211_vm3, %v210_v23, %v208_v17 }
  0x8a   :  { %v222_v3 = vsel %vm203_vm1, %v221_v54, %v220_v55  ;;  %v382_v55 = vld [vmem:[%s794_s5 + $0x68] sm:$0xff] }
  0x8e   :  { %v102_v24 = vpop.xlane.xlu1 %101  ;;  %v108_v25 = vpop.xlane.xlu2 %107 }
  0x8f   :  { %v93_v26 = vpop.xlane.xlu0 %92  ;;  %v227_v52 = vperm.slane %v108_v25, %v642_v4  ;;  %v223_v56 = vperm.slane %v102_v24, %v645_v5 }
  0x90   :  { %v218_v27 = vperm.slane %v93_v26, %v659_v21 }
  0x91   :  { %v224_v11 = vsel %vm207_vm2, %v223_v56, %v222_v3  ;;  %v377_v3 = vld [vmem:[%s794_s5 + $0x40] sm:$0xff] }
  0x92   :  { %v219_v30 = vsel %vm211_vm3, %v218_v27, %v217_v28 }
  0x93   :  { %v667_v31 = vsel %vm262_vm4, %v219_v30, %v212_v29 }
  0x96   :  { %v105_v32 = vpop.xlane.xlu1 %104  ;;  %v114_v33 = vpop.xlane.xlu2 %113 }
  0x97   :  { %v111_v34 = vpop.xlane.xlu0 %110  ;;  %v225_v58 = vperm.slane %v105_v32, %v659_v21  ;;  %v230_v59 = vperm.slane %v114_v33, %v645_v5 }
  0x98   :  { %v228_v53 = vperm.slane %v111_v34, %v648_v6 }
  0x99   :  { %v226_v14 = vsel %vm211_vm3, %v225_v58, %v224_v11  ;;  %v381_v58 = vld [vmem:[%s794_s5 + $0x60] sm:$0xff] }
  0x9a   :  { %v229_v60 = vsel %vm203_vm1, %v228_v53, %v227_v52  ;;  %v265_v30 = vsel %vm264_vm6, %v226_v14, %v667_v31  ;;  %v383_v53 = vld [vmem:[%s794_s5 + $0x70] sm:$0xff]  ;;  %v373_v14 = vld [vmem:[%s794_s5 + $0x20] sm:$0xff] }
  0x9b   :  { %v231_v15 = vsel %vm207_vm2, %v230_v59, %v229_v60  ;;  %v380_v60 = vld [vmem:[%s794_s5 + $0x58] sm:$0xff] }
  0x9e   :  { %v123_v35 = vpop.xlane.xlu1 %122  ;;  %v117_v36 = vpop.xlane.xlu2 %116 }
  0x9f   :  { %v120_v37 = vpop.xlane.xlu0 %119  ;;  %v235_v61 = vperm.slane %v123_v35, %v648_v6  ;;  %v232_v63 = vperm.slane %v117_v36, %v659_v21 }
  0xa0   :  { %v234_v0 = vperm.slane %v120_v37, %v642_v4 }
  0xa1   :  { %v233_v18 = vsel %vm211_vm3, %v232_v63, %v231_v15  ;;  %v379_v63 = vld [vmem:[%s794_s5 + $0x50] sm:$0xff] }
  0xa2   :  { %v236_v19 = vsel %vm203_vm1, %v235_v61, %v234_v0 }
  0xa6   :  { %v132_v39 = vpop.xlane.xlu1 %131  ;;  %v135_v40 = vpop.xlane.xlu2 %134 }
  0xa7   :  { %v126_v41 = vpop.xlane.xlu0 %125  ;;  %v241_v7 = vperm.slane %v132_v39, %v642_v4  ;;  %v242_v8 = vperm.slane %v135_v40, %v648_v6  ;;  %v36_v40 = vld [vmem:[#allocation2] sm:$0xff] }
  0xa8   :  { %v237_v9 = vperm.slane %v126_v41, %v645_v5 }
  0xa9   :  { %v243_v23 = vsel %vm203_vm1, %v242_v8, %v241_v7  ;;  %v376_v8 = vld [vmem:[%s794_s5 + $0x38] sm:$0xff] }
  0xaa   :  { %v238_v24 = vsel %vm207_vm2, %v237_v9, %v236_v19 }
  0xae   :  { %v138_v44 = vpop.xlane.xlu1 %137  ;;  %v144_v45 = vpop.xlane.xlu2 %143 }
  0xaf   :  { %v129_v47 = vpop.xlane.xlu0 %128  ;;  %v248_v1 = vperm.slane %v144_v45, %v642_v4  ;;  %v244_v12 = vperm.slane %v138_v44, %v645_v5  ;;  %v477_v45 = vmov 8.0  }
  0xb0   :  { %v239_v13 = vperm.slane %v129_v47, %v659_v21  ;;  %444 = vrcp.f32 %v477_v45  ;;  %v441_v47 = vld [vmem:[%s791_s2] ss:$0 sm:$0xff] }
  0xb1   :  { %v245_v27 = vsel %vm207_vm2, %v244_v12, %v243_v23  ;;  %v374_v12 = vld [vmem:[%s794_s5 + $0x28] sm:$0xff]  ;;  %v369_v23 = vld [vmem:[%s794_s5] sm:$0xff] }
  0xb2   :  { %v240_v28 = vsel %vm211_vm3, %v239_v13, %v238_v24 }
  0xb6   :  { %v141_v49 = vpop.xlane.xlu1 %140  ;;  %v150_v50 = vpop.xlane.xlu2 %149 }
  0xb7   :  { %v147_v51 = vpop.xlane.xlu0 %146  ;;  %v246_v16 = vperm.slane %v141_v49, %v659_v21  ;;  %v251_v17 = vperm.slane %v150_v50, %v645_v5  ;;  %v384_v50 = vld [vmem:[%s794_s5 + $0x78] sm:$0xff] }
  0xb8   :  { %v249_v2 = vperm.slane %v147_v51, %v648_v6  ;;  %385 = vmatpush.msra.mxu1 %v384_v50 }
  0xb9   :  { %v247_v32 = vsel %vm211_vm3, %v246_v16, %v245_v27  ;;  %v372_v16 = vld [vmem:[%s794_s5 + $0x18] sm:$0xff] }
  0xba   :  { %v250_v20 = vsel %vm203_vm1, %v249_v2, %v248_v1  ;;  %386 = vmatpush.msra.mxu1 %v383_v53  ;;  %v378_v1 = vld [vmem:[%s794_s5 + $0x48] sm:$0xff] }
  0xbb   :  { %v252_v33 = vsel %vm207_vm2, %v251_v17, %v250_v20  ;;  %v370_v20 = vld [vmem:[%s794_s5 + $0x8] sm:$0xff] }
  0xbc   :  { %387 = vmatpush.msra.mxu1 %v382_v55 }
  0xbe   :  { %v159_v57 = vpop.xlane.xlu1 %158  ;;  %v153_v10 = vpop.xlane.xlu2 %152  ;;  %388 = vmatpush.msra.mxu1 %v381_v58 }
  0xbf   :  { %v156_v62 = vpop.xlane.xlu0 %155  ;;  %v253_v22 = vperm.slane %v153_v10, %v659_v21  ;;  %v256_v25 = vperm.slane %v159_v57, %v648_v6  ;;  %v267_v6 = vsel %vm266_vm7, %v233_v18, %v265_v30  ;;  %v375_v10 = vld [vmem:[%s794_s5 + $0x30] sm:$0xff] }
  0xc0   :  { %v255_v26 = vperm.slane %v156_v62, %v642_v4  ;;  %v269_v37 = vsel %vm268_vm8, %v240_v28, %v267_v6  ;;  %389 = vmatpush.msra.mxu1 %v380_v60  ;;  %v371_v18 = vld [vmem:[%s794_s5 + $0x10] sm:$0xff] }
  0xc1   :  { %v254_v4 = vsel %vm211_vm3, %v253_v22, %v252_v33  ;;  %v271_v39 = vsel %vm270_vm9, %v247_v32, %v269_v37 }
  0xc2   :  { %v257_v38 = vsel %vm203_vm1, %v256_v25, %v255_v26  ;;  %v273_v41 = vsel %vm272_vm10, %v254_v4, %v271_v39  ;;  %390 = vmatpush.msra.mxu1 %v379_v63 }
  0xc4   :  { %391 = vmatpush.msra.mxu1 %v378_v1 }
  0xc6   :  { %v165_v29 = vpop.xlane.xlu1 %164  ;;  %392 = vmatpush.msra.mxu1 %v377_v3 }
  0xc7   :  { %v162_v34 = vpop.xlane.xlu0 %161  ;;  %v260_v35 = vperm.slane %v165_v29, %v659_v21 }
  0xc8   :  { %v258_v36 = vperm.slane %v162_v34, %v645_v5  ;;  %v445_v5 = vpop.eup %444  ;;  %393 = vmatpush.msra.mxu1 %v376_v8 }
  0xc9   :  { %v330_v46 = vmul.f32 8.0, %v445_v5  ;;  %vm334_vm12 = vweird.f32 %v445_v5 }
  0xca   :  { %v259_v31 = vsel %vm207_vm2, %v258_v36, %v257_v38  ;;  %394 = vmatpush.msra.mxu1 %v375_v10  ;;  %v443_v36 = vld [vmem:[%s793_s4] ss:$0 sm:$0xff] }
  0xcb   :  { %v261_v42 = vsel %vm211_vm3, %v260_v35, %v259_v31  ;;  %v331_v51 = vsub.f32 1.0, %v330_v46  ;;  %v442_v35 = vld [vmem:[%s792_s3] ss:$0 sm:$0xff]  ;;  %s478_s3 = smov [#allocation4]  }
  0xcc   :  { %v275_v43 = vsel %vm274_vm11, %v261_v42, %v273_v41  ;;  %395 = vmatpush.msra.mxu1 %v374_v12  ;;  %s426_s4 = sshll.u32 %s478_s3, 4  ;;  %s427_s4 = int_to_ptr.vmem [resolvable:$true] %s426_s4 }
  0xcd   :  { %v277_v21 = vadd.f32 %v275_v43, %v36_v40  ;;  %v332_v56 = vmul.f32 %v445_v5, %v331_v51 }
  0xce   :  { %396 = vmatpush.msra.mxu1 %v373_v14 }
  0xcf   :  { %279 = vst.msk [vmem:[#allocation2] sm:$0xff] %vm34_vm5, %v277_v21  ;;  %v333_v61 = vadd.f32 %v445_v5, %v332_v56 }
  0xd0   :  { %397 = vmatpush.msra.mxu1 %v372_v16 }
  0xd1   :  { %v335_v2 = vsel %vm334_vm12, %v445_v5, %v333_v61 }
  0xd2   :  { %398 = vmatpush.msra.mxu1 %v371_v18 }
  0xd4   :  { %399 = vmatpush.msra.mxu1 %v370_v20 }
  0xd6   :  { %v284_v44 = vld [vmem:[#allocation2] sm:$0xff]  ;;  %400 = vmatpush.msra.mxu1 %v369_v23 }
  0xd7   :  { %437 = vmatmul.msk.f32.vlgmr.msra.gmra.mxu0 %vm34_vm5, %v284_v44 }
 0x154   :  { %v309_v48 = vpop.f32.mrf.mxu0 }
 0x155   :  { %v317_v49 = vmul.f32 0.0625, %v309_v48 }
 0x157   :  { %v322_v52 = vadd.f32 %v441_v47, %v317_v49 }
 0x159   :  { %v323_v54 = vrot.slane %v322_v52, 4 }
 0x15b   :  { %v324_v57 = vadd.f32 %v323_v54, %v322_v52 }
 0x15d   :  { %v325_v59 = vrot.slane %v324_v57, 2 }
 0x15f   :  { %v326_v62 = vadd.f32 %v325_v59, %v324_v57 }
 0x161   :  { %v327_v0 = vrot.slane %v326_v62, 1 }
 0x163   :  { %v328_v7 = vadd.f32 %v327_v0, %v326_v62 }
 0x165   :  { %v336_v9 = vmul.f32 %v335_v2, %v328_v7 }
 0x167   :  { %v337_v11 = vsub.f32 %v322_v52, %v336_v9 }
 0x169   :  { %v338_v13 = vmul.f32 %v337_v11, %v337_v11 }
 0x16b   :  { %v339_v15 = vrot.slane %v338_v13, 4 }
 0x16d   :  { %v340_v17 = vadd.f32 %v339_v15, %v338_v13 }
 0x16f   :  { %v341_v19 = vrot.slane %v340_v17, 2 }
 0x171   :  { %v342_v22 = vadd.f32 %v341_v19, %v340_v17 }
 0x173   :  { %v343_v24 = vrot.slane %v342_v22, 1 }
 0x175   :  { %v344_v25 = vadd.f32 %v343_v24, %v342_v22 }
 0x177   :  { %v345_v26 = vmul.f32 %v344_v25, %v335_v2 }
 0x179   :  { %v346_v27 = vadd.f32 1e-05, %v345_v26 }
 0x17b   :  { %446 = vrsqrt.f32 %v346_v27  ;;  %vm353_vm14 = vweird.f32 %v346_v27 }
 0x181   :  { %v447_v28 = vpop.eup %446 }
 0x182   :  { %v348_v29 = vmul.f32 %v447_v28, %v346_v27  ;;  %vm354_vm13 = vweird.f32 %v447_v28 }
 0x183   :  { %vm355_vm15 = vmor %vm353_vm14, %vm354_vm13 }
 0x184   :  { %v349_v30 = vmul.f32 %v447_v28, %v348_v29 }
 0x186   :  { %v350_v32 = vmul.f32 0.5, %v349_v30 }
 0x188   :  { %v351_v33 = vsub.f32 1.5, %v350_v32 }
 0x18a   :  { %v352_v34 = vmul.f32 %v447_v28, %v351_v33 }
 0x18c   :  { %v356_v6 = vsel %vm355_vm15, %v447_v28, %v352_v34 }
 0x18d   :  { %v357_v4 = vmul.f32 %v356_v6, %v337_v11 }
 0x18f   :  { %v362_v37 = vmul.f32 %v442_v35, %v357_v4 }
 0x191   :  { %v367_v38 = vadd.f32 %v443_v36, %v362_v37 }
 0x193   :  { %v368_v39 = vmax.f32 %v367_v38, 0.0 }
 0x195   :  { %401 = vmatmul.f32.vlgmr.msra.gmra.mxu1 %v368_v39 }
 0x212   :  { %v402_v31 = vpop.f32.mrf.mxu1 }
 0x213   :  { %v405_v40 = vmul.f32 %v402_v31, %v402_v31 }
 0x215   :  { %406 = vadd.xlane.f32.xlu2 %v405_v40 }
 0x288   :  { %v407_v41 = vpop.xlane.xlu2 %406 }
 0x289   :  { %v408_v42 = vmax.f32 %v407_v41, 1e-24 }
 0x28b   :  { %448 = vrsqrt.f32 %v408_v42  ;;  %vm415_vm1 = vweird.f32 %v408_v42 }
 0x291   :  { %v449_v43 = vpop.eup %448 }
 0x292   :  { %v410_v21 = vmul.f32 %v449_v43, %v408_v42  ;;  %vm416_vm0 = vweird.f32 %v449_v43 }
 0x293   :  { %vm417_vm2 = vmor %vm415_vm1, %vm416_vm0 }
 0x294   :  { %v411_v44 = vmul.f32 %v449_v43, %v410_v21 }
 0x296   :  { %v412_v45 = vmul.f32 0.5, %v411_v44 }
 0x298   :  { %v413_v5 = vsub.f32 1.5, %v412_v45 }
 0x29a   :  { %v414_v46 = vmul.f32 %v449_v43, %v413_v5 }
 0x29c   :  { %v418_v47 = vsel %vm417_vm2, %v449_v43, %v414_v46 }
 0x29d   :  { %v419_v48 = vmul.f32 %v418_v47, %v402_v31 }
 0x29f   :  { %420 = vst [vmem:[#allocation4] sm:$0xff] %v419_v48 }
 0x2a0   :  { %431 = dma.vmem_to_hbm [thread:$0]  %s427_s4, 128, %s429_s30, [#allocation5]  }
 0x2a1   :  { %474 = dma.done.wait [#allocation5], 128  }
 0x2a2   :  { %475 = vsyncadd [#allocation5], 4294967168 }
 0x2a3   :  { %436 = vsyncpa [#allocation5], 1 }

</bundles_post_ra>
